<compile_context>
chip_gen: v6e
topology: v6e:2x2x1
jax: 0.10.0
libtpu: 0.0.40
codegen_flags: <defaults>
</compile_context>

<pallas_src>
import jax
import jax.numpy as jnp
from jax.experimental import pallas as pl
from jax.experimental.pallas import tpu as pltpu

# TODO(synk): SentenceTransformer.encode (frozen pretrained transformer) has no
# Pallas equivalent; the kernel starts from the embedding matrix.

EMBED_DIM = 384
H1 = 256
H2 = 128
NUM_CHOICES = 4
TILE_N = 1024  # rows per grid step (sweepable 1024-2048; keep >=2 tiles on v7x)


def _round_up(x, m):
    return ((x + m - 1) // m) * m


def _mlp_kernel(x_ref, w1_ref, b1_ref, w2_ref, b2_ref, w3_ref, b3_ref, o_ref):
    # In-kernel bf16 cast of the input tile (no wrapper-side cast/pad pass).
    x = x_ref[...].astype(jnp.bfloat16)                      # (tile_n, 384)

    h1 = jnp.dot(x, w1_ref[...], preferred_element_type=jnp.float32)
    h1 = jnp.maximum(h1 + b1_ref[...], 0.0)                  # (tile_n, 256) f32

    h2 = jnp.dot(h1.astype(jnp.bfloat16), w2_ref[...],
                 preferred_element_type=jnp.float32)
    h2 = jnp.maximum(h2 + b2_ref[...], 0.0)                  # (tile_n, 128) f32

    # Final 128->1 projection on VPU (broadcast multiply) + XLU (lane reduce):
    # avoids the explicit transpose and the M=1 MXU matmul entirely.
    scores = jnp.sum(h2 * w3_ref[...], axis=-1, keepdims=True) + b3_ref[...]
    o_ref[...] = scores.astype(o_ref.dtype)                  # (tile_n, 1)


def prepare_params(w1, b1, w2, b2, w3, b3):
    """One-time parameter prep (hoisted out of the per-call hot path)."""
    return (
        w1.astype(jnp.bfloat16),                    # (384, 256) bf16
        b1.reshape(1, H1).astype(jnp.float32),      # (1, 256)  f32
        w2.astype(jnp.bfloat16),                    # (256, 128) bf16
        b2.reshape(1, H2).astype(jnp.float32),      # (1, 128)  f32
        w3.reshape(1, H2).astype(jnp.float32),      # (1, 128)  f32 (VPU layer)
        b3.reshape(1, 1).astype(jnp.float32),       # (1, 1)    f32
    )


@jax.jit
def mlp_scores(x, params):
    """x: (N, EMBED_DIM) with N = batch * 4 -> scores (batch, 4)."""
    w1, b1, w2, b2, w3, b3 = params
    n = x.shape[0]
    assert n % NUM_CHOICES == 0, "rows must be batch * 4 choices"

    # Clamp the tile for small inputs; otherwise use the large tile so the
    # per-grid-step overhead is amortized (and >=2 tiles feed both v7x TCs).
    tile_n = min(TILE_N, _round_up(n, 8))
    num_tiles = pl.cdiv(n, tile_n)

    out = pl.pallas_call(
        _mlp_kernel,
        out_shape=jax.ShapeDtypeStruct((n, 1), jnp.float32),
        grid_spec=pltpu.PrefetchScalarGridSpec(
            num_scalar_prefetch=0,
            grid=(num_tiles,),
            in_specs=[
                # Native-dtype input tile; ragged last block handled by Pallas
                # edge clamping (garbage tail rows never reach the output).
                pl.BlockSpec((tile_n, EMBED_DIM), lambda i: (i, 0)),
                pl.BlockSpec((EMBED_DIM, H1), lambda i: (0, 0)),
                pl.BlockSpec((1, H1), lambda i: (0, 0)),
                pl.BlockSpec((H1, H2), lambda i: (0, 0)),
                pl.BlockSpec((1, H2), lambda i: (0, 0)),
                pl.BlockSpec((1, H2), lambda i: (0, 0)),
                pl.BlockSpec((1, 1), lambda i: (0, 0)),
            ],
            out_specs=pl.BlockSpec((tile_n, 1), lambda i: (i, 0)),
        ),
        compiler_params=pltpu.CompilerParams(
            dimension_semantics=("parallel",),
            vmem_limit_bytes=32 * 1024 * 1024,  # headroom (v5e default is 16 MiB)
        ),
    )(x, w1, b1, w2, b2, w3, b3)

    return out.reshape(-1, NUM_CHOICES)          # (batch, 4), contiguous


def init_params(key):
    """Deterministic parameter init (PyTorch nn.Linear-style uniform bounds)."""
    ks = jax.random.split(key, 6)

    def linear(kw, kb, fan_in, fan_out):
        bound = 1.0 / jnp.sqrt(fan_in)
        w = jax.random.uniform(kw, (fan_in, fan_out), jnp.float32, -bound, bound)
        b = jax.random.uniform(kb, (fan_out,), jnp.float32, -bound, bound)
        return w, b

    w1, b1 = linear(ks[0], ks[1], EMBED_DIM, H1)
    w2, b2 = linear(ks[2], ks[3], H1, H2)
    w3, b3 = linear(ks[4], ks[5], H2, 1)
    return w1, b1, w2, b2, w3, b3


def reference(x, w1, b1, w2, b2, w3, b3):
    # Mirrors the kernel's numerics: bf16 matmul inputs / f32 accumulate for the
    # first two layers, pure f32 for the final 128->1 projection.
    bf = lambda a: a.astype(jnp.bfloat16).astype(jnp.float32)
    h1 = jnp.maximum(bf(x) @ bf(w1) + b1, 0.0)
    h2 = jnp.maximum(bf(h1) @ bf(w2) + b2, 0.0)
    return (h2 @ w3.reshape(H2, 1) + b3).reshape(-1, NUM_CHOICES)


if __name__ == "__main__":
    key = jax.random.PRNGKey(0)
    k_x, k_p, k_x2 = jax.random.split(key, 3)

    w1, b1, w2, b2, w3, b3 = init_params(k_p)
    params = prepare_params(w1, b1, w2, b2, w3, b3)

    # Small single-tile case (batch=2, 4 choices).
    batch = 2
    x = jax.random.normal(k_x, (batch * NUM_CHOICES, EMBED_DIM), jnp.float32)
    scores = jax.block_until_ready(mlp_scores(x, params))
    ref = reference(x, w1, b1, w2, b2, w3, b3)
    assert scores.shape == (batch, NUM_CHOICES)
    assert jnp.allclose(scores, ref, atol=2e-3, rtol=2e-3)

    # Multi-tile case with a ragged tail (exercises grid > 1 + edge-block clamp).
    batch2 = 300  # 1200 rows -> 2 tiles of 1024 (second tile partial)
    x2 = jax.random.normal(k_x2, (batch2 * NUM_CHOICES, EMBED_DIM), jnp.float32)
    scores2 = jax.block_until_ready(mlp_scores(x2, params))
    ref2 = reference(x2, w1, b1, w2, b2, w3, b3)
    assert scores2.shape == (batch2, NUM_CHOICES)
    assert jnp.allclose(scores2, ref2, atol=2e-3, rtol=2e-3)

    print("KERNEL_OK")
</pallas_src>

<mosaic_0001>
module attributes {stable_mosaic.version = 11 : i64} {
  func.func @_mlp_kernel(%arg0: i32, %arg1: memref<8x384xf32, #tpu.memory_space<vmem>>, %arg2: memref<384x256xbf16, #tpu.memory_space<vmem>>, %arg3: memref<1x256xf32, #tpu.memory_space<vmem>>, %arg4: memref<256x128xbf16, #tpu.memory_space<vmem>>, %arg5: memref<1x128xf32, #tpu.memory_space<vmem>>, %arg6: memref<1x128xf32, #tpu.memory_space<vmem>>, %arg7: memref<1x1xf32, #tpu.memory_space<vmem>>, %arg8: memref<8x1xf32, #tpu.memory_space<vmem>>) attributes {dimension_semantics = [#tpu.dimension_semantics<parallel>], iteration_bounds = array<i64: 1>, scalar_prefetch = 0 : i64, scratch_operands = 0 : i64, tpu.core_type = #tpu.core_type<tc>, window_params = [{transform_indices = @transform_0, window_bounds = array<i64: 8, 384>}, {pipeline_mode = #tpu.pipeline_mode<synchronous>, transform_indices = @transform_1, window_bounds = array<i64: 384, 256>}, {pipeline_mode = #tpu.pipeline_mode<synchronous>, transform_indices = @transform_2, window_bounds = array<i64: 1, 256>}, {pipeline_mode = #tpu.pipeline_mode<synchronous>, transform_indices = @transform_3, window_bounds = array<i64: 256, 128>}, {pipeline_mode = #tpu.pipeline_mode<synchronous>, transform_indices = @transform_4, window_bounds = array<i64: 1, 128>}, {pipeline_mode = #tpu.pipeline_mode<synchronous>, transform_indices = @transform_5, window_bounds = array<i64: 1, 128>}, {pipeline_mode = #tpu.pipeline_mode<synchronous>, transform_indices = @transform_6, window_bounds = array<i64: 1, 1>}, {transform_indices = @transform_7, window_bounds = array<i64: 8, 1>}]} {
    %c0 = arith.constant 0 : index
    %c0_0 = arith.constant 0 : index
    %0 = vector.load %arg1[%c0, %c0_0] : memref<8x384xf32, #tpu.memory_space<vmem>>, vector<8x384xf32>
    %1 = arith.truncf %0 : vector<8x384xf32> to vector<8x384xbf16>
    %c0_1 = arith.constant 0 : index
    %c0_2 = arith.constant 0 : index
    %2 = vector.load %arg2[%c0_1, %c0_2] : memref<384x256xbf16, #tpu.memory_space<vmem>>, vector<384x256xbf16>
    %cst = arith.constant dense<0.000000e+00> : vector<8x256xf32>
    %3 = tpu.matmul %1, %2, %cst {dimension_numbers = #tpu.dot_dimension_numbers<[1], [0], [0], [1], [0, 0, 1, 1], [], []>} : vector<8x384xbf16>, vector<384x256xbf16>, vector<8x256xf32> -> vector<8x256xf32>
    %c0_3 = arith.constant 0 : index
    %c0_4 = arith.constant 0 : index
    %4 = vector.load %arg3[%c0_3, %c0_4] : memref<1x256xf32, #tpu.memory_space<vmem>>, vector<1x256xf32>
    %5 = vector.broadcast %4 : vector<1x256xf32> to vector<8x256xf32>
    %6 = arith.addf %3, %5 : vector<8x256xf32>
    %cst_5 = arith.constant 0.000000e+00 : f32
    %7 = vector.broadcast %cst_5 : f32 to vector<8x256xf32>
    %8 = arith.maximumf %6, %7 : vector<8x256xf32>
    %9 = arith.truncf %8 : vector<8x256xf32> to vector<8x256xbf16>
    %c0_6 = arith.constant 0 : index
    %c0_7 = arith.constant 0 : index
    %10 = vector.load %arg4[%c0_6, %c0_7] : memref<256x128xbf16, #tpu.memory_space<vmem>>, vector<256x128xbf16>
    %cst_8 = arith.constant dense<0.000000e+00> : vector<8x128xf32>
    %11 = tpu.matmul %9, %10, %cst_8 {dimension_numbers = #tpu.dot_dimension_numbers<[1], [0], [0], [1], [0, 0, 1, 1], [], []>} : vector<8x256xbf16>, vector<256x128xbf16>, vector<8x128xf32> -> vector<8x128xf32>
    %c0_9 = arith.constant 0 : index
    %c0_10 = arith.constant 0 : index
    %12 = vector.load %arg5[%c0_9, %c0_10] : memref<1x128xf32, #tpu.memory_space<vmem>>, vector<1x128xf32>
    %13 = vector.broadcast %12 : vector<1x128xf32> to vector<8x128xf32>
    %14 = arith.addf %11, %13 : vector<8x128xf32>
    %cst_11 = arith.constant 0.000000e+00 : f32
    %15 = vector.broadcast %cst_11 : f32 to vector<8x128xf32>
    %16 = arith.maximumf %14, %15 : vector<8x128xf32>
    %c0_12 = arith.constant 0 : index
    %c0_13 = arith.constant 0 : index
    %17 = vector.load %arg6[%c0_12, %c0_13] : memref<1x128xf32, #tpu.memory_space<vmem>>, vector<1x128xf32>
    %18 = vector.broadcast %17 : vector<1x128xf32> to vector<8x128xf32>
    %19 = arith.mulf %16, %18 : vector<8x128xf32>
    %cst_14 = arith.constant dense<0.000000e+00> : vector<8xf32>
    %20 = vector.multi_reduction <add>, %19, %cst_14 [1] : vector<8x128xf32> to vector<8xf32>
    %21 = vector.shape_cast %20 : vector<8xf32> to vector<8x1xf32>
    %c0_15 = arith.constant 0 : index
    %c0_16 = arith.constant 0 : index
    %22 = vector.load %arg7[%c0_15, %c0_16] : memref<1x1xf32, #tpu.memory_space<vmem>>, vector<1x1xf32>
    %23 = vector.broadcast %22 : vector<1x1xf32> to vector<8x1xf32>
    %24 = arith.addf %21, %23 : vector<8x1xf32>
    %c0_17 = arith.constant 0 : index
    %c0_18 = arith.constant 0 : index
    %25 = vector.load %arg8[%c0_17, %c0_18] : memref<8x1xf32, #tpu.memory_space<vmem>>, vector<8x1xf32>
    tpu.vector_store %arg8[%c0_17, %c0_18], %24 {strides = array<i32>} : memref<8x1xf32, #tpu.memory_space<vmem>>, vector<8x1xf32>,
    return
  }
  func.func @transform_0(%arg0: i32) -> (i32, i32) {
    %c0_i32 = arith.constant 0 : i32
    %c0_i32_0 = arith.constant 0 : i32
    return %arg0, %c0_i32 : i32, i32
  }
  func.func @transform_1(%arg0: i32) -> (i32, i32) {
    %c0_i32 = arith.constant 0 : i32
    %c0_i32_0 = arith.constant 0 : i32
    %c0_i32_1 = arith.constant 0 : i32
    return %c0_i32, %c0_i32_0 : i32, i32
  }
  func.func @transform_2(%arg0: i32) -> (i32, i32) {
    %c0_i32 = arith.constant 0 : i32
    %c0_i32_0 = arith.constant 0 : i32
    %c0_i32_1 = arith.constant 0 : i32
    return %c0_i32, %c0_i32_0 : i32, i32
  }
  func.func @transform_3(%arg0: i32) -> (i32, i32) {
    %c0_i32 = arith.constant 0 : i32
    %c0_i32_0 = arith.constant 0 : i32
    %c0_i32_1 = arith.constant 0 : i32
    return %c0_i32, %c0_i32_0 : i32, i32
  }
  func.func @transform_4(%arg0: i32) -> (i32, i32) {
    %c0_i32 = arith.constant 0 : i32
    %c0_i32_0 = arith.constant 0 : i32
    %c0_i32_1 = arith.constant 0 : i32
    return %c0_i32, %c0_i32_0 : i32, i32
  }
  func.func @transform_5(%arg0: i32) -> (i32, i32) {
    %c0_i32 = arith.constant 0 : i32
    %c0_i32_0 = arith.constant 0 : i32
    %c0_i32_1 = arith.constant 0 : i32
    return %c0_i32, %c0_i32_0 : i32, i32
  }
  func.func @transform_6(%arg0: i32) -> (i32, i32) {
    %c0_i32 = arith.constant 0 : i32
    %c0_i32_0 = arith.constant 0 : i32
    %c0_i32_1 = arith.constant 0 : i32
    return %c0_i32, %c0_i32_0 : i32, i32
  }
  func.func @transform_7(%arg0: i32) -> (i32, i32) {
    %c0_i32 = arith.constant 0 : i32
    %c0_i32_0 = arith.constant 0 : i32
    return %arg0, %c0_i32 : i32, i32
  }
}

</mosaic_0001>

<bundles_post_ra>
// kernel: mlp_scores.1
= control target key start
LH: loop header
LB: loop body
LE: loop exit
PB: predicated region body
PF: predicated region fallthrough
CT: control target
= control target key end

     0   :  { %s983_s0 = inlined_call_operand.hbm [shape: f32[8,384], index: 0, kind: input, shape index: {}]   ;;  %s984_s1 = inlined_call_operand.hbm [shape: bf16[384,256], index: 1, kind: input, shape index: {}]   ;;  %s985_s2 = inlined_call_operand.vmem [shape: f32[1,256], index: 2, kind: input, shape index: {}]   ;;  %s986_s3 = inlined_call_operand.hbm [shape: bf16[256,128], index: 3, kind: input, shape index: {}]   ;;  %s987_s4 = inlined_call_operand.vmem [shape: f32[1,128], index: 4, kind: input, shape index: {}]   ;;  %s988_s5 = inlined_call_operand.vmem [shape: f32[1,128], index: 5, kind: input, shape index: {}]   ;;  %s989_s6 = inlined_call_operand.<no memory space> [shape: f32[1,1], index: 6, kind: input, shape index: {}]   ;;  %s990_s7 = inlined_call_operand.vmem [shape: f32[8,1], index: 7, kind: output, shape index: {}]  }
   0x1   :  { %v12_v0 = vstv %s989_s6 }
   0x2   :  { %13 = vst [vmem:[#allocation2] sm:$0x1] %v12_v0 }
   0x3   :  { %14 = vsyncpa [#allocation4], 0 }
   0x4   :  { %15 = vsyncpa [#allocation6], 0  ;;  %s911_s26 = smov [#allocation5]  }
   0x5   :  { %s31_s27 = sshll.u32 %s911_s26, 4  ;;  %s32_s27 = int_to_ptr.vmem [resolvable:$true] %s31_s27 }
   0x6   :  { %s855_s28 = scalar_lea.vmem %s32_s27, 6144  ;;  %p860_p1 = scmp.lt.s32.totalorder %s32_s27, %s32_s27 }
   0x7   :  { %p856_p0 = scmp.ne.s32.totalorder %s32_s27, %s855_s28  ;;  %p861_p2 = scmp.lt.s32.totalorder %s855_s28, %s855_s28 }
   0x9   :  { %p862_p3 = por %p861_p2, %p860_p1 }
   0xb   :  { %p863_p4 = pnand %p862_p3, %p856_p0 }
   0xd   :  { %866 = shalt.err (!%p863_p4)
}
   0xe   :  { %s912_s29 = smov 128   ;;  %s913_s30 = smov 8  }
   0xf   :  { %37 = dma.hbm_to_vmem [thread:$0]  %s984_s1, 6144, %s32_s27, [#allocation6], %s912_s29, %s912_s29, %s913_s30  }
  0x10   :  { %s914_s6 = smov [#allocation3]   ;;  %s915_s11 = smov [#allocation7]  }
  0x11   :  { %s22_s10 = sshll.u32 %s914_s6, 4  ;;  %s45_s12 = sshll.u32 %s915_s11, 4  ;;  %s23_s10 = int_to_ptr.vmem [resolvable:$true] %s22_s10  ;;  %s46_s12 = int_to_ptr.vmem [resolvable:$true] %s45_s12 }
  0x12   :  { %s875_s13 = scalar_lea.vmem %s23_s10, 384  ;;  %p880_p6 = scmp.lt.s32.totalorder %s23_s10, %s23_s10 }
  0x13   :  { %p876_p5 = scmp.ne.s32.totalorder %s23_s10, %s875_s13  ;;  %p881_p7 = scmp.lt.s32.totalorder %s875_s13, %s875_s13 }
  0x15   :  { %p882_p8 = por %p881_p7, %p880_p6 }
  0x17   :  { %p883_p9 = pnand %p882_p8, %p876_p5 }
  0x19   :  { %886 = shalt.err (!%p883_p9)
}
  0x1a   :  { %25 = dma.hbm_to_vmem [thread:$0]  %s983_s0, 384, %s23_s10, [#allocation4]  }
  0x1b   :  { %s895_s16 = scalar_lea.vmem %s46_s12, 2048  ;;  %p900_p11 = scmp.lt.s32.totalorder %s46_s12, %s46_s12 }
  0x1c   :  { %p896_p10 = scmp.ne.s32.totalorder %s46_s12, %s895_s16  ;;  %p901_p12 = scmp.lt.s32.totalorder %s895_s16, %s895_s16 }
  0x1e   :  { %p902_p13 = por %p901_p12, %p900_p11 }
  0x20   :  { %p903_p0 = pnand %p902_p13, %p896_p10 }
  0x22   :  { %906 = shalt.err (!%p903_p0)
}
  0x23   :  { %s916_s1 = smov 64   ;;  %s917_s17 = smov 4  }
  0x24   :  { %51 = dma.hbm_to_vmem [thread:$0]  %s986_s3, 2048, %s46_s12, [#allocation6], %s916_s1, %s916_s1, %s917_s17  }
  0x25   :  { %907 = dma.done.wait [#allocation4], 384  }
  0x26   :  { %908 = vsyncadd [#allocation4], 4294966912 }
  0x27   :  { %909 = dma.done.wait [#allocation6], 8192  }
  0x28   :  { %910 = vsyncadd [#allocation6], 4294959104  ;;  %v918_v1 = vmov 0   ;;  %v759_v2 = vld [vmem:[#allocation5 + $0x74] ss:$8 sps:$4 sm:$0xff]   ;;  %v835_v52 = vld [vmem:[#allocation7 + $0x68] sm:$0xff]  }
  0x29   :  { %447 = vmatprep.mubr.bf16.mxu1 %v918_v1  ;;  %v761_v3 = vld [vmem:[#allocation5 + $0x70] ss:$8 sps:$4 sm:$0xff]   ;;  %374 = vmatprep.subr.bf16.mxu0 %v759_v2  ;;  %v762_v4 = vld [vmem:[#allocation5 + $0x64] ss:$8 sps:$4 sm:$0xff]   ;;  %v764_v5 = vld [vmem:[#allocation5 + $0x60] ss:$8 sps:$4 sm:$0xff]  }
  0x2a   :  { %375 = vmatpush1.bf16.msra.mxu0 %v761_v3  ;;  %v765_v6 = vld [vmem:[#allocation5 + $0x54] ss:$8 sps:$4 sm:$0xff]   ;;  %v767_v7 = vld [vmem:[#allocation5 + $0x50] ss:$8 sps:$4 sm:$0xff]   ;;  %v768_v8 = vld [vmem:[#allocation5 + $0x44] ss:$8 sps:$4 sm:$0xff]  }
  0x2b   :  { %376 = vmatprep.subr.bf16.mxu0 %v762_v4  ;;  %v770_v9 = vld [vmem:[#allocation5 + $0x40] ss:$8 sps:$4 sm:$0xff]   ;;  %v782_v10 = vld [vmem:[#allocation5 + $0x174] ss:$8 sps:$4 sm:$0xff]   ;;  %v785_v11 = vld [vmem:[#allocation5 + $0x170] ss:$8 sps:$4 sm:$0xff]  }
  0x2c   :  { %v771_v12 = vld [vmem:[#allocation5 + $0x34] ss:$8 sps:$4 sm:$0xff]   ;;  %415 = vmatprep.subr.bf16.mxu1 %v782_v10  ;;  %v788_v13 = vld [vmem:[#allocation5 + $0x164] ss:$8 sps:$4 sm:$0xff]   ;;  %v791_v14 = vld [vmem:[#allocation5 + $0x160] ss:$8 sps:$4 sm:$0xff]  }
  0x2d   :  { %416 = vmatpush1.bf16.msra.mxu1 %v785_v11  ;;  %v773_v15 = vld [vmem:[#allocation5 + $0x30] ss:$8 sps:$4 sm:$0xff]   ;;  %v774_v16 = vld [vmem:[#allocation5 + $0x24] ss:$8 sps:$4 sm:$0xff]   ;;  %v794_v17 = vld [vmem:[#allocation5 + $0x154] ss:$8 sps:$4 sm:$0xff]   ;;  %v124_v11 = vlaneseq }
  0x2e   :  { %377 = vmatpush1.bf16.msra.mxu0 %v764_v5  ;;  %417 = vmatprep.subr.bf16.mxu1 %v788_v13  ;;  %v797_v18 = vld [vmem:[#allocation5 + $0x150] ss:$8 sps:$4 sm:$0xff]   ;;  %v776_v19 = vld [vmem:[#allocation5 + $0x20] ss:$8 sps:$4 sm:$0xff]   ;;  %v800_v20 = vld [vmem:[#allocation5 + $0x144] ss:$8 sps:$4 sm:$0xff]  }
  0x2f   :  { %378 = vmatprep.subr.bf16.mxu0 %v765_v6  ;;  %v777_v21 = vld [vmem:[#allocation5 + $0x14] ss:$8 sps:$4 sm:$0xff]   ;;  %v779_v22 = vld [vmem:[#allocation5 + $0x10] ss:$8 sps:$4 sm:$0xff]   ;;  %v803_v23 = vld [vmem:[#allocation5 + $0x140] ss:$8 sps:$4 sm:$0xff]  }
  0x30   :  { %v806_v24 = vld [vmem:[#allocation5 + $0x134] ss:$8 sps:$4 sm:$0xff]   ;;  %v780_v25 = vld [vmem:[#allocation5 + $0x4] ss:$8 sps:$4 sm:$0xff]   ;;  %v809_v26 = vld [vmem:[#allocation5 + $0x130] ss:$8 sps:$4 sm:$0xff]  }
  0x31   :  { %418 = vmatpush1.bf16.msra.mxu1 %v791_v14  ;;  %v784_v27 = vld [vmem:[#allocation5] ss:$8 sps:$4 sm:$0xff]   ;;  %v812_v28 = vld [vmem:[#allocation5 + $0x124] ss:$8 sps:$4 sm:$0xff]   ;;  %v786_v29 = vld [vmem:[#allocation5 + $0xf4] ss:$8 sps:$4 sm:$0xff]  }
  0x32   :  { %379 = vmatpush1.bf16.msra.mxu0 %v767_v7  ;;  %419 = vmatprep.subr.bf16.mxu1 %v794_v17  ;;  %v815_v30 = vld [vmem:[#allocation5 + $0x120] ss:$8 sps:$4 sm:$0xff]   ;;  %v790_v31 = vld [vmem:[#allocation5 + $0xf0] ss:$8 sps:$4 sm:$0xff]   ;;  %v818_v32 = vld [vmem:[#allocation5 + $0x114] ss:$8 sps:$4 sm:$0xff]  }
  0x33   :  { %380 = vmatprep.subr.bf16.mxu0 %v768_v8  ;;  %v792_v33 = vld [vmem:[#allocation5 + $0xe4] ss:$8 sps:$4 sm:$0xff]   ;;  %v69_v34 = vld [vmem:[#allocation3 + $0x8] sm:$0xff]  ;;  %v796_v35 = vld [vmem:[#allocation5 + $0xe0] ss:$8 sps:$4 sm:$0xff]   ;;  %v125_v13 = vshrl.u32 %v124_v11, 7 }
  0x34   :  { %v72_v36 = vpack.c.bf16 %v69_v34, %v69_v34  ;;  %v821_v37 = vld [vmem:[#allocation5 + $0x110] ss:$8 sps:$4 sm:$0xff]   ;;  %v824_v38 = vld [vmem:[#allocation5 + $0x104] ss:$8 sps:$4 sm:$0xff]   ;;  %v798_v39 = vld [vmem:[#allocation5 + $0xd4] ss:$8 sps:$4 sm:$0xff]  }
  0x35   :  { %420 = vmatpush1.bf16.msra.mxu1 %v797_v18  ;;  %v802_v40 = vld [vmem:[#allocation5 + $0xd0] ss:$8 sps:$4 sm:$0xff]   ;;  %v827_v41 = vld [vmem:[#allocation5 + $0x100] ss:$8 sps:$4 sm:$0xff]   ;;  %v804_v42 = vld [vmem:[#allocation5 + $0xc4] ss:$8 sps:$4 sm:$0xff]  }
  0x36   :  { %381 = vmatpush1.bf16.msra.mxu0 %v770_v9  ;;  %421 = vmatprep.subr.bf16.mxu1 %v800_v20  ;;  %v70_v43 = vld [vmem:[#allocation3 + $0x10] sm:$0xff]  ;;  %v808_v46 = vld [vmem:[#allocation5 + $0xc0] ss:$8 sps:$4 sm:$0xff]   ;;  %v833_v48 = vld [vmem:[#allocation7 + $0x70] sm:$0xff]   ;;  %v126_v14 = vsub.s32 0, %v125_v13  ;;  %vm654_vm0 = vcmask 7168  }
  0x37   :  { %382 = vmatprep.subr.bf16.mxu0 %v771_v12  ;;  %406 = vmatprep.mubr.bf16.mxu0 %v72_v36  ;;  %v831_v44 = vld [vmem:[#allocation7 + $0x78] sm:$0xff]   ;;  %v73_v47 = vpack.c.bf16 %v70_v43, %v70_v43  ;;  %v834_v50 = vld [vmem:[#allocation7 + $0x30] sm:$0xff]   ;;  %v816_v53 = vld [vmem:[#allocation5 + $0xa4] ss:$8 sps:$4 sm:$0xff]  }
  0x38   :  { %v832_v45 = vld [vmem:[#allocation7 + $0x38] sm:$0xff]   ;;  %v836_v54 = vld [vmem:[#allocation7 + $0x28] sm:$0xff]   ;;  %v837_v56 = vld [vmem:[#allocation7 + $0x60] sm:$0xff]  }
  0x39   :  { %422 = vmatpush1.bf16.msra.mxu1 %v803_v23  ;;  %v810_v49 = vld [vmem:[#allocation5 + $0xb4] ss:$8 sps:$4 sm:$0xff]   ;;  %v814_v51 = vld [vmem:[#allocation5 + $0xb0] ss:$8 sps:$4 sm:$0xff]   ;;  %v820_v55 = vld [vmem:[#allocation5 + $0xa0] ss:$8 sps:$4 sm:$0xff]  }
  0x3a   :  { %383 = vmatpush1.bf16.msra.mxu0 %v773_v15  ;;  %423 = vmatprep.subr.bf16.mxu1 %v806_v24  ;;  %v822_v57 = vld [vmem:[#allocation5 + $0x94] ss:$8 sps:$4 sm:$0xff]   ;;  %v838_v58 = vld [vmem:[#allocation7 + $0x20] sm:$0xff]   ;;  %v826_v59 = vld [vmem:[#allocation5 + $0x90] ss:$8 sps:$4 sm:$0xff]  }
  0x3b   :  { %384 = vmatprep.subr.bf16.mxu0 %v774_v16  ;;  %v828_v60 = vld [vmem:[#allocation5 + $0x84] ss:$8 sps:$4 sm:$0xff]   ;;  %v830_v61 = vld [vmem:[#allocation5 + $0x80] ss:$8 sps:$4 sm:$0xff]   ;;  %v839_v0 = vld [vmem:[#allocation7 + $0x58] sm:$0xff]   ;;  %v130_v16 = vsub.s32 1, %v125_v13 }
  0x3c   :  { %v68_v62 = vld [vmem:[#allocation3] sm:$0xff]  ;;  %v840_v1 = vld [vmem:[#allocation7 + $0x18] sm:$0xff]   ;;  %v841_v2 = vld [vmem:[#allocation7 + $0x50] sm:$0xff]  }
  0x3d   :  { %424 = vmatpush1.bf16.msra.mxu1 %v809_v26  ;;  %v71_v63 = vpack.c.bf16 %v68_v62, %v68_v62  ;;  %v842_v3 = vld [vmem:[#allocation7 + $0x10] sm:$0xff]   ;;  %v843_v4 = vld [vmem:[#allocation7 + $0x48] sm:$0xff]   ;;  %v845_v6 = vld [vmem:[#allocation7 + $0x40] sm:$0xff]  }
  0x3e   :  { %385 = vmatpush1.bf16.msra.mxu0 %v776_v19  ;;  %425 = vmatprep.subr.bf16.mxu1 %v812_v28  ;;  %v844_v5 = vld [vmem:[#allocation7 + $0x8] sm:$0xff]   ;;  %v846_v7 = vld [vmem:[#allocation7] sm:$0xff]  }
  0x3f   :  { %386 = vmatprep.subr.bf16.mxu0 %v777_v21  ;;  %v122_v15 = vld [vmem:[%s985_s2] sm:$0x3] }
  0x40   :  { %v127_v17 = vrot.slane %v122_v15, %v126_v14  ;;  %v131_v18 = vrot.slane %v122_v15, %v130_v16 }
  0x41   :  { %426 = vmatpush1.bf16.msra.mxu1 %v815_v30 }
  0x42   :  { %387 = vmatpush1.bf16.msra.mxu0 %v779_v22  ;;  %427 = vmatprep.subr.bf16.mxu1 %v818_v32 }
  0x43   :  { %388 = vmatprep.subr.bf16.mxu0 %v780_v25 }
  0x45   :  { %428 = vmatpush1.bf16.msra.mxu1 %v821_v37 }
  0x46   :  { %389 = vmatpush1.bf16.msra.mxu0 %v784_v27  ;;  %429 = vmatprep.subr.bf16.mxu1 %v824_v38  ;;  %v727_v38 = vld [vmem:[%s988_s5] ss:$0 sm:$0xff] }
  0x47   :  { %390 = vmatprep.subr.bf16.mxu0 %v786_v29 }
  0x49   :  { %430 = vmatpush1.bf16.msra.mxu1 %v827_v41  ;;  %v728_v41 = vld [vmem:[#allocation2] ss:$0 sm:$0xff] }
  0x4a   :  { %391 = vmatpush2.bf16.msra.mxu0 %v790_v31  ;;  %729 = vmatprep.subr.bf16.mxu1 %v831_v44 }
  0x4b   :  { %392 = vmatprep.subr.bf16.mxu0 %v792_v33  ;;  %v710_v33 = vld [vmem:[%s987_s4] ss:$0 sm:$0xff] }
  0x4c   :  { %448 = vmatmul.mubr.bf16.vlgmr.msra.gmra.mxu1 %v73_v47 }
  0x4d   :  { %730 = vmatpush3.bf16.msra.mxu1 %v832_v45 }
  0x4e   :  { %393 = vmatpush2.bf16.msra.mxu0 %v796_v35  ;;  %731 = vmatprep.subr.bf16.mxu1 %v833_v48 }
  0x4f   :  { %394 = vmatprep.subr.bf16.mxu0 %v798_v39 }
  0x51   :  { %732 = vmatpush3.bf16.msra.mxu1 %v834_v50 }
  0x52   :  { %395 = vmatpush2.bf16.msra.mxu0 %v802_v40  ;;  %733 = vmatprep.subr.bf16.mxu1 %v835_v52 }
  0x53   :  { %396 = vmatprep.subr.bf16.mxu0 %v804_v42 }
  0x55   :  { %734 = vmatpush3.bf16.msra.mxu1 %v836_v54 }
  0x56   :  { %397 = vmatpush2.bf16.msra.mxu0 %v808_v46  ;;  %735 = vmatprep.subr.bf16.mxu1 %v837_v56 }
  0x57   :  { %398 = vmatprep.subr.bf16.mxu0 %v810_v49 }
  0x59   :  { %736 = vmatpush3.bf16.msra.mxu1 %v838_v58 }
  0x5a   :  { %399 = vmatpush2.bf16.msra.mxu0 %v814_v51  ;;  %737 = vmatprep.subr.bf16.mxu1 %v839_v0 }
  0x5b   :  { %400 = vmatprep.subr.bf16.mxu0 %v816_v53 }
  0x5d   :  { %738 = vmatpush3.bf16.msra.mxu1 %v840_v1 }
  0x5e   :  { %401 = vmatpush2.bf16.msra.mxu0 %v820_v55  ;;  %739 = vmatprep.subr.bf16.mxu1 %v841_v2 }
  0x5f   :  { %402 = vmatprep.subr.bf16.mxu0 %v822_v57 }
  0x61   :  { %740 = vmatpush3.bf16.msra.mxu1 %v842_v3 }
  0x62   :  { %403 = vmatpush2.bf16.msra.mxu0 %v826_v59  ;;  %741 = vmatprep.subr.bf16.mxu1 %v843_v4 }
  0x63   :  { %404 = vmatprep.subr.bf16.mxu0 %v828_v60 }
  0x65   :  { %742 = vmatpush3.bf16.msra.mxu1 %v844_v5 }
  0x66   :  { %405 = vmatpush2.bf16.msra.mxu0 %v830_v61  ;;  %743 = vmatprep.subr.bf16.mxu1 %v845_v6 }
  0x69   :  { %407 = vmatmul.mubr.bf16.vlgmr.msra.gmra.mxu0 %v71_v63  ;;  %744 = vmatpush3.bf16.msra.mxu1 %v846_v7 }
 0x10c   :  { %v449_v8 = vpop.f32.mrf.mxu1 }
 0x10e   :  { %v451_v9 = vpop.f32.mrf.mxu1 }
 0x110   :  { %v453_v10 = vpop.f32.mrf.mxu1 }
 0x112   :  { %v454_v12 = vpop.f32.mrf.mxu1 }
 0x129   :  { %v408_v19 = vpop.f32.mrf.mxu0 }
 0x12a   :  { %v409_v20 = vadd.f32 %v408_v19, %v127_v17 }
 0x12b   :  { %v410_v21 = vpop.f32.mrf.mxu0 }
 0x12c   :  { %v450_v22 = vadd.f32 %v449_v8, %v409_v20  ;;  %v411_v23 = vadd.f32 %v410_v21, %v131_v18 }
 0x12d   :  { %v412_v24 = vpop.f32.mrf.mxu0 }
 0x12e   :  { %v452_v25 = vadd.f32 %v451_v9, %v411_v23  ;;  %v456_v26 = vmax.f32 %v450_v22, 0.0 }
 0x12f   :  { %v413_v27 = vpop.f32.mrf.mxu0 }
 0x130   :  { %v457_v28 = vmax.f32 %v452_v25, 0.0  ;;  %v458_v30 = vpack.c.bf16 %v456_v26, %v456_v26 }
 0x132   :  { %v459_v29 = vpack.c.bf16 %v457_v28, %v457_v28 }
 0x134   :  { %627 = vmatprep.mubr.bf16.mxu1 %v459_v29 }
 0x135   :  { %628 = vmatmul.mubr.bf16.vlgmr.msra.gmra.mxu1 %v458_v30 }
 0x1f5   :  { %v745_v31 = vpop.f32.mrf.mxu1 }
 0x1f7   :  { %v746_v32 = vpop.f32.mrf.mxu1 }
 0x1f8   :  { %v747_v34 = vadd.f32 %v746_v32, %v745_v31 }
 0x1f9   :  { %v748_v35 = vpop.f32.mrf.mxu1 }
 0x1fa   :  { %v630_v36 = vadd.f32 %v747_v34, %v710_v33 }
 0x1fb   :  { %v749_v37 = vpop.f32.mrf.mxu1 }
 0x1fc   :  { %v635_v39 = vmax.f32 %v630_v36, 0.0 }
 0x1fe   :  { %v643_v40 = vmul.f32 %v727_v38, %v635_v39 }
 0x200   :  { %644 = vadd.xlane.f32.xlu0 %v643_v40 }
 0x289   :  { %v645_v42 = vpop.xlane.xlu0 %644 }
 0x28a   :  { %v653_v43 = vadd.f32 %v728_v41, %v645_v42 }
 0x28c   :  { %655 = vst.msk [vmem:[%s990_s7] sm:$0xff] %vm654_vm0, %v653_v43 }
 0x28d   :  { %660 = vsyncpa [#allocation4], 1 }
 0x28e   :  { %661 = vsyncpa [#allocation6], 1 }

</bundles_post_ra>
